<compile_context>
chip_gen: v6e
topology: v6e:2x2x1
jax: 0.10.0
libtpu: 0.0.40
codegen_flags: <defaults>
</compile_context>

<pallas_src>
import functools
import math

import jax
import jax.numpy as jnp
from jax import lax
from jax.experimental import pallas as pl
from jax.experimental.pallas import tpu as pltpu


_NEG_INF = -1e30   # finite "minus infinity": keeps exp() NaN-free


def _pick_tile(dim, cap, align):
    """Largest `align`-multiple <= cap that divides `dim`; full dim if none."""
    if dim <= cap:
        return dim
    t = (cap // align) * align
    while t >= align:
        if dim % t == 0:
            return t
        t -= align
    return dim


def _heads_per_group(num_heads, head_dim):
    """Smallest head-group whose lane width (g*head_dim) is 128-aligned."""
    for g in range(1, num_heads + 1):
        if num_heads % g == 0 and (g * head_dim) % 128 == 0:
            return g
    return num_heads


# ---------------------------------------------------------------------------
# Kernel 1: GPT2 Conv1D projection  (y = x @ W + b), tiled over tokens x E_out.
# ---------------------------------------------------------------------------
def _conv1d_kernel(x_ref, w_ref, b_ref, o_ref):
    # x_ref: (TM, E_in), w_ref: (E_in, TN), b_ref: (1, TN), o_ref: (TM, TN)
    y = jnp.dot(x_ref[...], w_ref[...], preferred_element_type=jnp.float32)
    o_ref[...] = (y + b_ref[...]).astype(o_ref.dtype)


def conv1d_proj(x, w, b, *, tm_cap=256, tn_cap=512):
    """x: (B, S, E_in), w: (E_in, E_out), b: (E_out,) -> (B, S, E_out)."""
    B, S, E_in = x.shape
    E_out = w.shape[1]
    M = B * S
    TM = _pick_tile(M, tm_cap, 8)
    TN = _pick_tile(E_out, tn_cap, 128)
    # E_out axis outer, token axis inner: weight/bias blocks stay resident
    # across the whole inner token sweep.
    grid = (E_out // TN, M // TM)

    out = pl.pallas_call(
        _conv1d_kernel,
        out_shape=jax.ShapeDtypeStruct((M, E_out), x.dtype),
        grid=grid,
        in_specs=[
            pl.BlockSpec((TM, E_in), lambda n, m: (m, 0)),
            pl.BlockSpec((E_in, TN), lambda n, m: (0, n)),
            pl.BlockSpec((1, TN), lambda n, m: (0, n)),
        ],
        out_specs=pl.BlockSpec((TM, TN), lambda n, m: (m, n)),
        compiler_params=pltpu.CompilerParams(
            dimension_semantics=("parallel", "parallel")),
        cost_estimate=pl.CostEstimate(
            flops=2 * M * E_in * E_out,
            transcendentals=0,
            bytes_accessed=(M * E_in + E_in * E_out + M * E_out + E_out)
            * x.dtype.itemsize),
    )(x.reshape(M, E_in), w, b.reshape(1, E_out))
    return out.reshape(B, S, E_out)


# ---------------------------------------------------------------------------
# Kernel 2: causal flash attention.
#   grid = (batch, head_group, q_tile); K/V for the head group are resident
#   in VMEM (index map constant in the q-tile axis); the KV reduction is an
#   in-kernel loop with online softmax in f32 scratch and causal pruning.
# ---------------------------------------------------------------------------
def _flash_attn_kernel(q_ref, k_ref, v_ref, o_ref, m_ref, l_ref, acc_ref,
                       *, heads_per_group, head_dim, kv_tile, scale):
    # q_ref: (1, TQ, W)   k_ref/v_ref: (1, S_kv, W)   o_ref: (1, TQ, W)
    # m_ref/l_ref: (G, TQ, 1) f32     acc_ref: (G, TQ, D) f32
    G, D, TK = heads_per_group, head_dim, kv_tile
    TQ = q_ref.shape[1]

    q_start = pl.program_id(2) * TQ

    m_ref[...] = jnp.full_like(m_ref, _NEG_INF)
    l_ref[...] = jnp.zeros_like(l_ref)
    acc_ref[...] = jnp.zeros_like(acc_ref)

    def kv_step(ki, apply_mask):
        k_start = pl.multiple_of(ki * TK, TK)
        if apply_mask:  # only the diagonal band builds the iota mask
            row = q_start + lax.broadcasted_iota(jnp.int32, (TQ, TK), 0)
            col = k_start + lax.broadcasted_iota(jnp.int32, (TQ, TK), 1)
            visible = col <= row
        for g in range(G):  # static unroll over heads in the group
            lanes = slice(g * D, (g + 1) * D)
            qg = q_ref[0, :, lanes] * scale                 # (TQ, D), in dtype
            kg = k_ref[0, pl.ds(k_start, TK), lanes]        # (TK, D)
            vg = v_ref[0, pl.ds(k_start, TK), lanes]        # (TK, D)
            s = jnp.einsum("qd,kd->qk", qg, kg,
                           preferred_element_type=jnp.float32)   # MXU, f32 acc
            if apply_mask:
                s = jnp.where(visible, s, _NEG_INF)
            m_prev = m_ref[g]
            m_new = jnp.maximum(m_prev, jnp.max(s, axis=-1, keepdims=True))
            alpha = jnp.exp(m_prev - m_new)
            p = jnp.exp(s - m_new)
            l_ref[g] = alpha * l_ref[g] + jnp.sum(p, axis=-1, keepdims=True)
            acc_ref[g] = alpha * acc_ref[g] + jnp.einsum(
                "qk,kd->qd", p.astype(vg.dtype), vg,
                preferred_element_type=jnp.float32)
            m_ref[g] = m_new

    # Causal block pruning: KV tiles with k_start > q_end are never visited;
    # tiles strictly below the diagonal skip the mask entirely.
    num_full = q_start // TK                       # fully-visible KV tiles
    num_all = (q_start + TQ + TK - 1) // TK        # + diagonal band

    @pl.loop(0, num_full)
    def _unmasked(ki):
        kv_step(ki, apply_mask=False)

    @pl.loop(0, num_all - num_full)
    def _masked(i):
        kv_step(num_full + i, apply_mask=True)

    # Finalize (once per q tile, off the inner loop -> exact divide is free).
    outs = [(acc_ref[g] / l_ref[g]).astype(o_ref.dtype) for g in range(G)]
    o_ref[0] = outs[0] if G == 1 else jnp.concatenate(outs, axis=-1)


def flash_attention_fused_qkv(qkv, num_heads, head_dim, *,
                              tq_cap=256, tk_cap=256):
    """Causal MHA taking the fused (B, S, 3E) qkv tensor -> (B, S, E)."""
    B, S, E3 = qkv.shape
    E = E3 // 3
    H, D = num_heads, head_dim
    G = _heads_per_group(H, D)
    W = G * D
    TQ = _pick_tile(S, tq_cap, 8)
    TK = _pick_tile(S, tk_cap, 8)
    scale = 1.0 / math.sqrt(D)

    if W % 128 == 0:
        # Lane-dense head groups: slice q/k/v straight out of fused qkv.
        arrs = (qkv, qkv, qkv)
        q_off, k_off, v_off = 0, E // W, 2 * (E // W)
    else:
        # Small / odd configs: one group spanning all heads (W == E).
        q, k, v = jnp.split(qkv, 3, axis=-1)
        arrs = (q, k, v)
        q_off = k_off = v_off = 0

    kernel = functools.partial(
        _flash_attn_kernel, heads_per_group=G, head_dim=D, kv_tile=TK,
        scale=scale)

    grid = (B, H // G, S // TQ)   # qi innermost -> K/V blocks reused (no re-DMA)
    return pl.pallas_call(
        kernel,
        out_shape=jax.ShapeDtypeStruct((B, S, E), qkv.dtype),
        grid=grid,
        in_specs=[
            pl.BlockSpec((1, TQ, W), lambda b, g, qi, o=q_off: (b, qi, g + o)),
            pl.BlockSpec((1, S, W), lambda b, g, qi, o=k_off: (b, 0, g + o)),
            pl.BlockSpec((1, S, W), lambda b, g, qi, o=v_off: (b, 0, g + o)),
        ],
        out_specs=pl.BlockSpec((1, TQ, W), lambda b, g, qi: (b, qi, g)),
        scratch_shapes=[
            pltpu.VMEM((G, TQ, 1), jnp.float32),   # running max
            pltpu.VMEM((G, TQ, 1), jnp.float32),   # running denominator
            pltpu.VMEM((G, TQ, D), jnp.float32),   # running numerator
        ],
        compiler_params=pltpu.CompilerParams(
            dimension_semantics=("parallel", "parallel", "parallel")),
        cost_estimate=pl.CostEstimate(
            flops=2 * B * H * S * S * D,            # QK^T + PV with causal half
            transcendentals=B * H * S * S // 2,
            bytes_accessed=4 * B * S * E * qkv.dtype.itemsize),
    )(*arrs)


# ---------------------------------------------------------------------------
# Full module forward.
# ---------------------------------------------------------------------------
def gpt2_flash_attention2_forward(hidden_states, params, num_heads):
    """GPT2FlashAttention2.forward with attention_mask=None, layer_past=None,
    use_cache=False, eval mode (dropouts are identity)."""
    B, S, E = hidden_states.shape
    D = E // num_heads
    qkv = conv1d_proj(hidden_states, params["c_attn_w"], params["c_attn_b"])
    attn = flash_attention_fused_qkv(qkv, num_heads, D)      # (B, S, E)
    out = conv1d_proj(attn, params["c_proj_w"], params["c_proj_b"])
    return out
    # TODO(synk): padding-mask (_upad_input / varlen) path and KV-cache
    # (layer_past) concatenation are not exercised by the default forward
    # call (attention_mask=None, layer_past=None) and are not implemented.


# ---------------------------------------------------------------------------
# Pure-JAX reference for verification.
# ---------------------------------------------------------------------------
def reference_forward(hidden_states, params, num_heads):
    B, S, E = hidden_states.shape
    D = E // num_heads
    qkv = hidden_states @ params["c_attn_w"] + params["c_attn_b"]
    q, k, v = jnp.split(qkv, 3, axis=-1)

    def split_heads(t):
        return t.reshape(B, S, num_heads, D).transpose(0, 2, 1, 3)

    q, k, v = split_heads(q), split_heads(k), split_heads(v)
    s = jnp.einsum("bhqd,bhkd->bhqk", q, k) / math.sqrt(D)
    mask = jnp.tril(jnp.ones((S, S), dtype=bool))
    s = jnp.where(mask[None, None], s, _NEG_INF)
    p = jax.nn.softmax(s, axis=-1)
    o = jnp.einsum("bhqk,bhkd->bhqd", p, v)
    o = o.transpose(0, 2, 1, 3).reshape(B, S, E)
    return o @ params["c_proj_w"] + params["c_proj_b"]


if __name__ == "__main__":
    # Full-f32 matmuls for a tight numerical check (production would use bf16
    # inputs, where this setting is irrelevant).
    jax.config.update("jax_default_matmul_precision", "highest")

    def run_case(B, S, E, H, key):
        D = E // H
        k1, k2, k3, k4, k5 = jax.random.split(key, 5)
        params = {
            "c_attn_w": jax.random.normal(k1, (E, 3 * E), jnp.float32) * 0.02,
            "c_attn_b": jax.random.normal(k2, (3 * E,), jnp.float32) * 0.02,
            "c_proj_w": jax.random.normal(k3, (E, E), jnp.float32) * 0.02,
            "c_proj_b": jax.random.normal(k4, (E,), jnp.float32) * 0.02,
        }
        hidden = jax.random.normal(k5, (B, S, E), jnp.float32)

        out = jax.block_until_ready(
            gpt2_flash_attention2_forward(hidden, params, H))
        ref = reference_forward(hidden, params, H)
        assert out.shape == (B, S, E)
        err = float(jnp.max(jnp.abs(out - ref)))
        assert jnp.allclose(out, ref, atol=1e-4, rtol=1e-4), (
            f"mismatch vs reference for (B,S,E,H)={(B, S, E, H)}: max err {err}")

    master = jax.random.PRNGKey(0)
    key_a, key_b = jax.random.split(master, 2)

    # Tiny GPT2-like config (exercises the W == E fallback, single KV tile).
    run_case(B=2, S=8, E=32, H=4, key=key_a)
    # Small but realistically-laid-out config: head_dim=64 -> lane-dense head
    # pairs sliced from fused qkv, multiple q/kv tiles, causal pruning and
    # diagonal-band masking paths.
    run_case(B=2, S=512, E=256, H=4, key=key_b)

    print("KERNEL_OK")
</pallas_src>

<mosaic_0001>
module attributes {stable_mosaic.version = 11 : i64} {
  func.func @_conv1d_kernel(%arg0: i32, %arg1: i32, %arg2: memref<16x32xf32, #tpu.memory_space<vmem>>, %arg3: memref<32x96xf32, #tpu.memory_space<vmem>>, %arg4: memref<1x96xf32, #tpu.memory_space<vmem>>, %arg5: memref<16x96xf32, #tpu.memory_space<vmem>>) attributes {dimension_semantics = [#tpu.dimension_semantics<parallel>, #tpu.dimension_semantics<parallel>], iteration_bounds = array<i64: 1, 1>, scalar_prefetch = 0 : i64, scratch_operands = 0 : i64, tpu.core_type = #tpu.core_type<tc>, window_params = [{transform_indices = @transform_0, window_bounds = array<i64: 16, 32>}, {transform_indices = @transform_1, window_bounds = array<i64: 32, 96>}, {transform_indices = @transform_2, window_bounds = array<i64: 1, 96>}, {transform_indices = @transform_3, window_bounds = array<i64: 16, 96>}]} {
    %c0 = arith.constant 0 : index
    %c0_0 = arith.constant 0 : index
    %0 = vector.load %arg2[%c0, %c0_0] : memref<16x32xf32, #tpu.memory_space<vmem>>, vector<16x32xf32>
    %c0_1 = arith.constant 0 : index
    %c0_2 = arith.constant 0 : index
    %1 = vector.load %arg3[%c0_1, %c0_2] : memref<32x96xf32, #tpu.memory_space<vmem>>, vector<32x96xf32>
    %cst = arith.constant dense<0.000000e+00> : vector<16x96xf32>
    %2 = tpu.matmul %0, %1, %cst {dimension_numbers = #tpu.dot_dimension_numbers<[1], [0], [0], [1], [0, 0, 1, 1], [], []>, precision = #tpu.contract_precision<fp32>} : vector<16x32xf32>, vector<32x96xf32>, vector<16x96xf32> -> vector<16x96xf32>
    %c0_3 = arith.constant 0 : index
    %c0_4 = arith.constant 0 : index
    %3 = vector.load %arg4[%c0_3, %c0_4] : memref<1x96xf32, #tpu.memory_space<vmem>>, vector<1x96xf32>
    %4 = vector.broadcast %3 : vector<1x96xf32> to vector<16x96xf32>
    %5 = arith.addf %2, %4 : vector<16x96xf32>
    %c0_5 = arith.constant 0 : index
    %c0_6 = arith.constant 0 : index
    %6 = vector.load %arg5[%c0_5, %c0_6] : memref<16x96xf32, #tpu.memory_space<vmem>>, vector<16x96xf32>
    tpu.vector_store %arg5[%c0_5, %c0_6], %5 {strides = array<i32>} : memref<16x96xf32, #tpu.memory_space<vmem>>, vector<16x96xf32>,
    return
  }
  func.func @transform_0(%arg0: i32, %arg1: i32) -> (i32, i32) {
    %c0_i32 = arith.constant 0 : i32
    %c0_i32_0 = arith.constant 0 : i32
    return %arg1, %c0_i32 : i32, i32
  }
  func.func @transform_1(%arg0: i32, %arg1: i32) -> (i32, i32) {
    %c0_i32 = arith.constant 0 : i32
    %c0_i32_0 = arith.constant 0 : i32
    return %c0_i32, %arg0 : i32, i32
  }
  func.func @transform_2(%arg0: i32, %arg1: i32) -> (i32, i32) {
    %c0_i32 = arith.constant 0 : i32
    %c0_i32_0 = arith.constant 0 : i32
    return %c0_i32, %arg0 : i32, i32
  }
  func.func @transform_3(%arg0: i32, %arg1: i32) -> (i32, i32) {
    %c0_i32 = arith.constant 0 : i32
    return %arg1, %arg0 : i32, i32
  }
}

</mosaic_0001>

<bundles_post_ra>
// kernel: tpu_custom_call.1
= control target key start
LH: loop header
LB: loop body
LE: loop exit
PB: predicated region body
PF: predicated region fallthrough
CT: control target
= control target key end

     0   :  { %8 = vsyncpa [#allocation3], 0  ;;  %s880_s0 = inlined_call_operand.hbm [shape: f32[16,32], index: 0, kind: input, shape index: {}]   ;;  %s881_s1 = inlined_call_operand.hbm [shape: f32[32,96], index: 1, kind: input, shape index: {}]   ;;  %s882_s2 = inlined_call_operand.vmem [shape: f32[1,96], index: 2, kind: input, shape index: {}]   ;;  %s883_s3 = inlined_call_operand.hbm [shape: f32[16,96], index: 3, kind: output, shape index: {}]  }
   0x1   :  { %9 = vsyncpa [#allocation6], 0 }
   0x2   :  { %10 = vsyncpa [#allocation4], 0  ;;  %s786_s12 = smov [#allocation2]  }
   0x3   :  { %s16_s13 = sshll.u32 %s786_s12, 4  ;;  %s17_s13 = int_to_ptr.vmem [resolvable:$true] %s16_s13 }
   0x4   :  { %s728_s14 = scalar_lea.vmem %s17_s13, 256  ;;  %p733_p1 = scmp.lt.s32.totalorder %s17_s13, %s17_s13 }
   0x5   :  { %p729_p0 = scmp.ne.s32.totalorder %s17_s13, %s728_s14  ;;  %p734_p2 = scmp.lt.s32.totalorder %s728_s14, %s728_s14 }
   0x7   :  { %p735_p3 = por %p734_p2, %p733_p1 }
   0x9   :  { %p736_p4 = pnand %p735_p3, %p729_p0 }
   0xb   :  { %739 = shalt.err (!%p736_p4)
}
   0xc   :  { %s787_s15 = smov 128   ;;  %s788_s16 = smov 8  }
   0xd   :  { %22 = dma.hbm_to_vmem [thread:$0]  %s880_s0, 256, %s17_s13, [#allocation3], %s787_s15, %s787_s15, %s788_s16  }
   0xe   :  { %s789_s19 = smov [#allocation5]  }
   0xf   :  { %s28_s20 = sshll.u32 %s789_s19, 4  ;;  %s29_s20 = int_to_ptr.vmem [resolvable:$true] %s28_s20 }
  0x10   :  { %s748_s21 = scalar_lea.vmem %s29_s20, 512  ;;  %p753_p6 = scmp.lt.s32.totalorder %s29_s20, %s29_s20 }
  0x11   :  { %p749_p5 = scmp.ne.s32.totalorder %s29_s20, %s748_s21  ;;  %p754_p7 = scmp.lt.s32.totalorder %s748_s21, %s748_s21 }
  0x13   :  { %p755_p8 = por %p754_p7, %p753_p6 }
  0x15   :  { %p756_p9 = pnand %p755_p8, %p749_p5 }
  0x17   :  { %759 = shalt.err (!%p756_p9)
}
  0x18   :  { %34 = dma.hbm_to_vmem [thread:$0]  %s881_s1, 512, %s29_s20, [#allocation6], %s787_s15, %s787_s15, %s788_s16  }
  0x19   :  { %780 = dma.done.wait [#allocation3], 256  }
  0x1a   :  { %781 = vsyncadd [#allocation3], 4294967040 }
  0x1b   :  { %782 = dma.done.wait [#allocation6], 512  }
  0x1c   :  { %783 = vsyncadd [#allocation6], 4294966784  ;;  %vm56_vm0 = vcmask 261120   ;;  %v48_v0 = vld [vmem:[#allocation5 + $0x18] sm:$0xff]  ;;  %v47_v1 = vld [vmem:[#allocation5 + $0x10] sm:$0xff]  ;;  %vm591_vm1 = vcmask 785408  }
  0x1d   :  { %v46_v2 = vld [vmem:[#allocation5 + $0x8] sm:$0xff]  ;;  %v823_v3 = vand.u32 4294901760, %v48_v0  ;;  %v825_v4 = vand.u32 4294901760, %v47_v1  ;;  %v45_v6 = vld [vmem:[#allocation5] sm:$0xff]  ;;  %v43_v7 = vld [vmem:[#allocation2] sm:$0xff] }
  0x1e   :  { %v827_v5 = vand.u32 4294901760, %v46_v2  ;;  %v44_v8 = vld [vmem:[#allocation2 + $0x8] sm:$0xff]  ;;  %v829_v9 = vand.u32 4294901760, %v45_v6  ;;  %v58_v10 = vsel %vm56_vm0, %v43_v7, 0  ;;  %v612_v39 = vld [vmem:[%s882_s2] ss:$0 sm:$0xff] }
  0x1f   :  { %v61_v11 = vsel %vm56_vm0, %v44_v8, 0  ;;  %649 = vmatprep.subr.mxu0 %v823_v3  ;;  %v178_v12 = vsub.f32 %v48_v0, %v823_v3  ;;  %v833_v13 = vand.u32 4294901760, %v58_v10  ;;  %v185_v15 = vsub.f32 %v47_v1, %v825_v4  ;;  %s790_s2 = smov [#allocation7]  }
  0x20   :  { %v835_v14 = vand.u32 4294901760, %v61_v11  ;;  %650 = vmatpush3.msra.mxu0 %v823_v3  ;;  %v192_v16 = vsub.f32 %v46_v2, %v827_v5  ;;  %v199_v17 = vsub.f32 %v45_v6, %v829_v9  ;;  %s599_s24 = sshll.u32 %s790_s2, 4  ;;  %s600_s24 = int_to_ptr.vmem [resolvable:$true] %s599_s24 }
  0x21   :  { %651 = vmatprep.subr.mxu0 %v825_v4  ;;  %v179_v18 = vand.u32 4294901760, %v178_v12  ;;  %v133_v19 = vsub.f32 %v58_v10, %v833_v13  ;;  %v186_v20 = vand.u32 4294901760, %v185_v15  ;;  %668 = vmatprep.mubr.f32.mxu1 %v833_v13  ;;  %s760_s25 = scalar_lea.vmem %s600_s24, 256  ;;  %p765_p11 = scmp.lt.s32.totalorder %s600_s24, %s600_s24 }
  0x22   :  { %v143_v21 = vsub.f32 %v61_v11, %v835_v14  ;;  %652 = vmatpush3.msra.mxu0 %v825_v4  ;;  %v193_v22 = vand.u32 4294901760, %v192_v16  ;;  %v200_v23 = vand.u32 4294901760, %v199_v17  ;;  %p761_p10 = scmp.ne.s32.totalorder %s600_s24, %s760_s25  ;;  %p766_p12 = scmp.lt.s32.totalorder %s760_s25, %s760_s25 }
  0x23   :  { %653 = vmatprep.subr.mxu0 %v827_v5  ;;  %v180_v24 = vsub.f32 %v178_v12, %v179_v18  ;;  %v134_v25 = vand.u32 4294901760, %v133_v19  ;;  %v187_v26 = vsub.f32 %v185_v15, %v186_v20 }
  0x24   :  { %v144_v27 = vand.u32 4294901760, %v143_v21  ;;  %654 = vmatpush3.msra.mxu0 %v827_v5  ;;  %v194_v28 = vsub.f32 %v192_v16, %v193_v22  ;;  %v201_v29 = vsub.f32 %v199_v17, %v200_v23  ;;  %p767_p13 = por %p766_p12, %p765_p11 }
  0x25   :  { %655 = vmatprep.subr.mxu0 %v829_v9  ;;  %v181_v30 = vand.u32 4294901760, %v180_v24  ;;  %v135_v31 = vsub.f32 %v133_v19, %v134_v25  ;;  %v188_v32 = vand.u32 4294901760, %v187_v26 }
  0x26   :  { %v145_v33 = vsub.f32 %v143_v21, %v144_v27  ;;  %656 = vmatpush3.msra.mxu0 %v829_v9  ;;  %v195_v36 = vand.u32 4294901760, %v194_v28  ;;  %v202_v37 = vand.u32 4294901760, %v201_v29  ;;  %p768_p0 = pnand %p767_p13, %p761_p10 }
  0x27   :  { %660 = vmatprep.subr.mxu1 %v181_v30  ;;  %v136_v34 = vand.u32 4294901760, %v135_v31  ;;  %671 = vmatprep.subr.mxu0 %v178_v12 }
  0x28   :  { %v146_v35 = vand.u32 4294901760, %v145_v33  ;;  %661 = vmatpush3.msra.mxu1 %v181_v30 }
  0x29   :  { %657 = vmatprep.mubr.f32.mxu0 %v136_v34  ;;  %662 = vmatprep.subr.mxu1 %v188_v32 }
  0x2a   :  { %658 = vmatmul.mubr.f32.vlgmr.msra.gmra.mxu0 %v146_v35  ;;  %663 = vmatpush3.msra.mxu1 %v188_v32 }
  0x2b   :  { %672 = vmatpush3.msra.mxu0 %v178_v12  ;;  %664 = vmatprep.subr.mxu1 %v195_v36 }
  0x2c   :  { %673 = vmatprep.subr.mxu0 %v185_v15  ;;  %665 = vmatpush3.msra.mxu1 %v195_v36 }
  0x2d   :  { %674 = vmatpush3.msra.mxu0 %v185_v15  ;;  %666 = vmatprep.subr.mxu1 %v202_v37 }
  0x2e   :  { %675 = vmatprep.subr.mxu0 %v192_v16  ;;  %667 = vmatpush3.msra.mxu1 %v202_v37 }
  0x2f   :  { %676 = vmatpush3.msra.mxu0 %v192_v16  ;;  %669 = vmatmul.mubr.f32.vlgmr.msra.gmra.mxu1 %v835_v14 }
  0x30   :  { %677 = vmatprep.subr.mxu0 %v199_v17  ;;  %682 = vmatprep.subr.mxu1 %v823_v3 }
  0x31   :  { %678 = vmatpush3.msra.mxu0 %v199_v17  ;;  %679 = vmatprep.mubr.f32.mxu0 %v133_v19 }
  0x32   :  { %683 = vmatpush3.msra.mxu1 %v823_v3  ;;  %680 = vmatmul.mubr.f32.vlgmr.msra.gmra.mxu0 %v143_v21 }
  0x33   :  { %684 = vmatprep.subr.mxu1 %v825_v4  ;;  %693 = vmatprep.subr.mxu0 %v179_v18 }
  0x34   :  { %685 = vmatpush3.msra.mxu1 %v825_v4  ;;  %694 = vmatpush3.msra.mxu0 %v179_v18 }
  0x35   :  { %686 = vmatprep.subr.mxu1 %v827_v5  ;;  %695 = vmatprep.subr.mxu0 %v186_v20 }
  0x36   :  { %687 = vmatpush3.msra.mxu1 %v827_v5  ;;  %696 = vmatpush3.msra.mxu0 %v186_v20 }
  0x37   :  { %688 = vmatprep.subr.mxu1 %v829_v9  ;;  %697 = vmatprep.subr.mxu0 %v193_v22 }
  0x38   :  { %689 = vmatpush3.msra.mxu1 %v829_v9  ;;  %690 = vmatprep.mubr.f32.mxu1 %v134_v25 }
  0x39   :  { %698 = vmatpush3.msra.mxu0 %v193_v22  ;;  %691 = vmatmul.mubr.f32.vlgmr.msra.gmra.mxu1 %v144_v27 }
  0x3a   :  { %699 = vmatprep.subr.mxu0 %v200_v23  ;;  %704 = vmatprep.subr.mxu1 %v823_v3 }
  0x3b   :  { %700 = vmatpush3.msra.mxu0 %v200_v23  ;;  %701 = vmatprep.mubr.f32.mxu0 %v833_v13 }
  0x3c   :  { %705 = vmatpush3.msra.mxu1 %v823_v3  ;;  %702 = vmatmul.mubr.f32.vlgmr.msra.gmra.mxu0 %v835_v14 }
  0x3d   :  { %706 = vmatprep.subr.mxu1 %v825_v4  ;;  %712 = vmatprep.mubr.f32.mxu1 %v833_v13 }
  0x3e   :  { %707 = vmatpush3.msra.mxu1 %v825_v4 }
  0x3f   :  { %708 = vmatprep.subr.mxu1 %v827_v5 }
  0x40   :  { %709 = vmatpush3.msra.mxu1 %v827_v5 }
  0x41   :  { %710 = vmatprep.subr.mxu1 %v829_v9 }
  0x42   :  { %711 = vmatpush3.msra.mxu1 %v829_v9 }
  0x43   :  { %713 = vmatmul.mubr.f32.vlgmr.msra.gmra.mxu1 %v835_v14 }
  0xea   :  { %v659_v38 = vpop.f32.mrf.mxu0 }
  0xeb   :  { %v149_v42 = vadd.f32 %v659_v38, %v612_v39 }
  0xec   :  { %v138_v40 = vpop.f32.mrf.mxu0 }
  0xed   :  { %v139_v43 = vadd.f32 %v612_v39, %v138_v40 }
  0xef   :  { %v670_v41 = vpop.f32.mrf.mxu1 }
  0xf0   :  { %v246_v46 = vadd.f32 %v670_v41, %v149_v42 }
  0xf1   :  { %v239_v44 = vpop.f32.mrf.mxu1 }
  0xf2   :  { %v681_v45 = vpop.f32.mrf.mxu0  ;;  %v240_v48 = vadd.f32 %v239_v44, %v139_v43 }
  0xf3   :  { %v333_v50 = vadd.f32 %v681_v45, %v246_v46 }
  0xf4   :  { %v325_v49 = vpop.f32.mrf.mxu0 }
  0xf5   :  { %v326_v53 = vadd.f32 %v325_v49, %v240_v48 }
  0xf9   :  { %v692_v47 = vpop.f32.mrf.mxu1 }
  0xfa   :  { %v418_v54 = vadd.f32 %v692_v47, %v333_v50 }
  0xfb   :  { %v409_v51 = vpop.f32.mrf.mxu1 }
  0xfc   :  { %v703_v52 = vpop.f32.mrf.mxu0  ;;  %v410_v55 = vadd.f32 %v409_v51, %v326_v53 }
  0xfd   :  { %v507_v57 = vadd.f32 %v703_v52, %v418_v54 }
  0xfe   :  { %v500_v56 = vpop.f32.mrf.mxu0 }
  0xff   :  { %v501_v59 = vadd.f32 %v500_v56, %v410_v55 }
 0x103   :  { %v714_v58 = vpop.f32.mrf.mxu1 }
 0x104   :  { %v588_v60 = vadd.f32 %v714_v58, %v507_v57 }
 0x105   :  { %v581_v61 = vpop.f32.mrf.mxu1 }
 0x106   :  { %v582_v62 = vadd.f32 %v581_v61, %v501_v59  ;;  %593 = vst.msk [vmem:[#allocation7 + $0x8] sm:$0xff] %vm591_vm1, %v588_v60 }
 0x108   :  { %592 = vst.msk [vmem:[#allocation7] sm:$0xff] %vm591_vm1, %v582_v62 }
 0x109   :  { %771 = shalt.err (!%p768_p0)
}
 0x10a   :  { %605 = dma.vmem_to_hbm [thread:$0]  %s600_s24, 256, %s883_s3, [#allocation4], %s787_s15, %s787_s15, %s788_s16  }
 0x10b   :  { %784 = dma.done.wait [#allocation4], 256  }
 0x10c   :  { %785 = vsyncadd [#allocation4], 4294967040 }
 0x10d   :  { %609 = vsyncpa [#allocation3], 1 }
 0x10e   :  { %610 = vsyncpa [#allocation6], 1 }
 0x10f   :  { %611 = vsyncpa [#allocation4], 1 }

</bundles_post_ra>
